<compile_context>
chip_gen: v7x
topology: tpu7x:2x2x1
jax: 0.10.0
libtpu: 0.0.40
codegen_flags: <defaults>
</compile_context>

<pallas_src>
import functools

import jax
import jax.numpy as jnp
from jax.experimental import pallas as pl
from jax.experimental.pallas import tpu as pltpu

_LANES = 128
_SUBLANES = 8
_SLAB_ELEMS = _SUBLANES * _LANES

# Tile-sized f32 temporaries the body materializes per logits element (f32 cast,
# shifted, exp/select path) on top of the pipelined input copies.
_F32_TEMPS_PER_ELEM = 3
# Blocks at or below this size get a third pipeline buffer (hides DMA issue latency).
_SMALL_BLOCK_BYTES = 2 * 1024 * 1024


def _vmem_limit_bytes():
    """Generation-aware scoped-VMEM limit (~75% of physical per-core VMEM)."""
    cap = 64 * 1024 * 1024  # conservative fallback (v7x-sized) if the query fails
    try:
        info = pltpu.get_tpu_info()
        queried = int(getattr(info, "vmem_capacity_bytes", 0))
        if queried > 0:
            cap = queried
    except Exception:
        pass
    # v5e/v6e (128 MiB physical) -> 96 MiB ; v7x (64 MiB physical) -> 48 MiB.
    return max(32 * 1024 * 1024, (cap * 3) // 4)


def _pick_tile_n(n, c, itemsize, vmem_limit, buffers=2):
    """Largest row tile whose kernel working set stays within ~60% of the limit.

    Working set per row = pipelined input copies (buffers * C * itemsize) plus the
    tile-sized f32 temporaries (~3 * C * 4).
    """
    budget = (vmem_limit * 3) // 5
    per_row = buffers * c * itemsize + _F32_TEMPS_PER_ELEM * c * 4
    max_rows = max(_SUBLANES, budget // per_row)
    tile = min(n, max_rows)
    if tile < n:
        # Keep the sublane dim a multiple of 8 when not covering the full array.
        tile = max(_SUBLANES, (tile // _SUBLANES) * _SUBLANES)
    elif n >= 2 * _SUBLANES:
        # Guarantee >=2 grid steps so the "parallel" axis spans both v7x TensorCores
        # (and gives the pipeline something to overlap). Keep a multiple of 8.
        half = (((n + 1) // 2) + _SUBLANES - 1) // _SUBLANES * _SUBLANES
        tile = max(_SUBLANES, min(tile, half))
    return tile


def _logits_block_spec(tile_n, c, triple_buffer):
    index_map = lambda i: (i, 0)
    if triple_buffer:
        try:
            return pl.BlockSpec((tile_n, c), index_map, pipeline_mode=pl.Buffered(3))
        except (AttributeError, TypeError):
            pass  # older jax: fall back to the default double-buffered pipeline
    return pl.BlockSpec((tile_n, c), index_map)


def _ce_tile_kernel(logits_ref, labels_ref, out_ref, *, n_rows, tile_n, mask_rows):
    """Cross-entropy partial sum for one row tile.

    logits_ref: (TILE_N, C)   caller dtype (f32 cast happens in VMEM)
    labels_ref: (TILE_N, 1)   int32
    out_ref:    (1, 8, 128)   f32 lane-dense slab holding this tile's loss sum
    """
    c = logits_ref.shape[-1]

    logits = logits_ref[...].astype(jnp.float32)                 # matches `.float()`
    labels = labels_ref[...]                                     # (TILE_N, 1) int32

    # Numerically stable log-softmax pieces.  Lane reductions go to the XLU and
    # exp/log to the EUP; per-element VALU cost is cast / subtract / compare / select.
    m = jnp.max(logits, axis=-1, keepdims=True)                  # (TILE_N, 1)
    shifted = logits - m                                         # (TILE_N, C)
    lse = jnp.log(jnp.sum(jnp.exp(shifted), axis=-1, keepdims=True))   # (TILE_N, 1)

    # One-hot pick of the label column: (1, C) lane iota broadcast against the
    # (TILE_N, 1) labels -- no full-tile iota materialization.
    col = jax.lax.broadcasted_iota(jnp.int32, (1, c), 1)
    picked = jnp.sum(jnp.where(col == labels, shifted, 0.0),
                     axis=-1, keepdims=True)                     # (TILE_N, 1)

    per_row = lse - picked                                       # (TILE_N, 1)

    if mask_rows:
        # Only traced when the last tile can be partial (n % tile_n != 0): zero out
        # padded rows so garbage (possibly inf/NaN) never reaches the tile sum.
        row = jax.lax.broadcasted_iota(jnp.int32, (tile_n, 1), 0)
        valid = pl.program_id(0) * tile_n + row < n_rows
        per_row = jnp.where(valid, per_row, 0.0)

    # Broadcast the scalar across the whole (8,128) vreg: unmasked lane-dense store.
    out_ref[...] = jnp.full(out_ref.shape, jnp.sum(per_row), dtype=jnp.float32)


def cross_entropy_loss(logits, labels):
    """logits: (N, C) float array, labels: (N,) int array. Returns scalar f32 mean loss."""
    n, c = logits.shape
    labels2d = labels.astype(jnp.int32).reshape(n, 1)

    itemsize = jnp.dtype(logits.dtype).itemsize
    vmem_limit = _vmem_limit_bytes()
    tile_n = _pick_tile_n(n, c, itemsize, vmem_limit)
    num_tiles = pl.cdiv(n, tile_n)
    mask_rows = (n % tile_n) != 0

    kernel = functools.partial(
        _ce_tile_kernel, n_rows=n, tile_n=tile_n, mask_rows=mask_rows)

    # Deeper pipelining only pays when the per-step block is small and there are
    # enough steps to overlap; at large C the extra buffer would shrink the tile.
    block_bytes = tile_n * c * itemsize
    triple_buffer = (block_bytes <= _SMALL_BLOCK_BYTES) and (num_tiles >= 3)
    logits_spec = _logits_block_spec(tile_n, c, triple_buffer)

    partial_sums = pl.pallas_call(
        kernel,
        out_shape=jax.ShapeDtypeStruct((num_tiles, _SUBLANES, _LANES), jnp.float32),
        grid_spec=pltpu.PrefetchScalarGridSpec(
            num_scalar_prefetch=0,
            grid=(num_tiles,),
            in_specs=[
                logits_spec,                                    # logits row tile
                pl.BlockSpec((tile_n, 1), lambda i: (i, 0)),    # labels row tile
            ],
            out_specs=pl.BlockSpec((1, _SUBLANES, _LANES), lambda i: (i, 0, 0)),
        ),
        compiler_params=pltpu.CompilerParams(
            dimension_semantics=("parallel",),   # independent tiles -> megacore-friendly
            vmem_limit_bytes=int(vmem_limit),    # generation-aware scoped limit
        ),
    )(logits, labels2d)

    # Dense lane-contiguous epilogue: each slab holds its tile_sum replicated across
    # 8*128 elements (exact power-of-two replication), so sum the whole slab and fold
    # the replication factor into the divisor.  Mean over all N rows.
    return jnp.sum(partial_sums) / jnp.float32(_SLAB_ELEMS * n)


if __name__ == "__main__":
    key = jax.random.PRNGKey(0)
    k_logits, k_labels = jax.random.split(key)

    N, C = 8, 32  # small synthetic shapes: batch=8, num_classes=32
    logits = jax.random.normal(k_logits, (N, C), dtype=jnp.float32)
    labels = jax.random.randint(k_labels, (N,), 0, C, dtype=jnp.int32)

    loss = cross_entropy_loss(logits, labels)
    jax.block_until_ready(loss)

    # Reference check in plain JAX (same math as nn.CrossEntropyLoss, mean reduction).
    ref = jnp.mean(
        jax.nn.logsumexp(logits, axis=-1)
        - jnp.take_along_axis(logits, labels[:, None], axis=-1)[:, 0]
    )
    assert jnp.allclose(loss, ref, atol=1e-5, rtol=1e-5), (loss, ref)

    print("KERNEL_OK")
</pallas_src>

<mosaic_0001>
module attributes {stable_mosaic.version = 11 : i64} {
  func.func @_ce_tile_kernel(%arg0: i32, %arg1: memref<8x32xf32, #tpu.memory_space<vmem>>, %arg2: memref<8x1xi32, #tpu.memory_space<vmem>>, %arg3: memref<1x8x128xf32, #tpu.memory_space<vmem>>) attributes {dimension_semantics = [#tpu.dimension_semantics<parallel>], iteration_bounds = array<i64: 1>, scalar_prefetch = 0 : i64, scratch_operands = 0 : i64, tpu.core_type = #tpu.core_type<tc>, window_params = [{transform_indices = @transform_0, window_bounds = array<i64: 8, 32>}, {transform_indices = @transform_1, window_bounds = array<i64: 8, 1>}, {transform_indices = @transform_2, window_bounds = array<i64: 1, 8, 128>}]} {
    %c0 = arith.constant 0 : index
    %c0_0 = arith.constant 0 : index
    %0 = vector.load %arg1[%c0, %c0_0] : memref<8x32xf32, #tpu.memory_space<vmem>>, vector<8x32xf32>
    %c0_1 = arith.constant 0 : index
    %c0_2 = arith.constant 0 : index
    %1 = vector.load %arg2[%c0_1, %c0_2] : memref<8x1xi32, #tpu.memory_space<vmem>>, vector<8x1xi32>
    %cst = arith.constant dense<0xFF800000> : vector<8xf32>
    %2 = vector.multi_reduction <maximumf>, %0, %cst [1] : vector<8x32xf32> to vector<8xf32>
    %3 = vector.shape_cast %2 : vector<8xf32> to vector<8x1xf32>
    %4 = vector.broadcast %3 : vector<8x1xf32> to vector<8x32xf32>
    %5 = arith.subf %0, %4 : vector<8x32xf32>
    %6 = math.exp %5 : vector<8x32xf32>
    %cst_3 = arith.constant dense<0.000000e+00> : vector<8xf32>
    %7 = vector.multi_reduction <add>, %6, %cst_3 [1] : vector<8x32xf32> to vector<8xf32>
    %8 = vector.shape_cast %7 : vector<8xf32> to vector<8x1xf32>
    %9 = math.log %8 : vector<8x1xf32>
    %10 = tpu.iota {dimensions = array<i32: 1>} : vector<1x32xi32>
    %11 = vector.broadcast %10 : vector<1x32xi32> to vector<8x32xi32>
    %12 = vector.broadcast %1 : vector<8x1xi32> to vector<8x32xi32>
    %13 = arith.cmpi eq, %11, %12 : vector<8x32xi32>
    %cst_4 = arith.constant 0.000000e+00 : f32
    %14 = vector.broadcast %cst_4 : f32 to vector<8x32xf32>
    %15 = arith.select %13, %5, %14 : vector<8x32xi1>, vector<8x32xf32>
    %cst_5 = arith.constant dense<0.000000e+00> : vector<8xf32>
    %16 = vector.multi_reduction <add>, %15, %cst_5 [1] : vector<8x32xf32> to vector<8xf32>
    %17 = vector.shape_cast %16 : vector<8xf32> to vector<8x1xf32>
    %18 = arith.subf %9, %17 : vector<8x1xf32>
    %19 = vector.shape_cast %18 : vector<8x1xf32> to vector<1x8x1xf32>
    %cst_6 = arith.constant dense<0.000000e+00> : vector<1xf32>
    %20 = vector.multi_reduction <add>, %19, %cst_6 [1, 2] : vector<1x8x1xf32> to vector<1xf32>
    %21 = vector.shape_cast %20 : vector<1xf32> to vector<1x1x1xf32>
    %22 = vector.extract %21[0, 0, 0] : f32 from vector<1x1x1xf32>
    %23 = vector.broadcast %22 : f32 to vector<1x8x128xf32>
    %c0_7 = arith.constant 0 : index
    %c0_8 = arith.constant 0 : index
    %c0_9 = arith.constant 0 : index
    %24 = vector.load %arg3[%c0_7, %c0_8, %c0_9] : memref<1x8x128xf32, #tpu.memory_space<vmem>>, vector<1x8x128xf32>
    tpu.vector_store %arg3[%c0_7, %c0_8, %c0_9], %23 {strides = array<i32>} : memref<1x8x128xf32, #tpu.memory_space<vmem>>, vector<1x8x128xf32>,
    return
  }
  func.func @transform_0(%arg0: i32) -> (i32, i32) {
    %c0_i32 = arith.constant 0 : i32
    %c0_i32_0 = arith.constant 0 : i32
    return %arg0, %c0_i32 : i32, i32
  }
  func.func @transform_1(%arg0: i32) -> (i32, i32) {
    %c0_i32 = arith.constant 0 : i32
    %c0_i32_0 = arith.constant 0 : i32
    return %arg0, %c0_i32 : i32, i32
  }
  func.func @transform_2(%arg0: i32) -> (i32, i32, i32) {
    %c0_i32 = arith.constant 0 : i32
    %c0_i32_0 = arith.constant 0 : i32
    %c0_i32_1 = arith.constant 0 : i32
    return %arg0, %c0_i32, %c0_i32_0 : i32, i32, i32
  }
}

</mosaic_0001>

<bundles_post_ra>
// kernel: tpu_custom_call.1
= control target key start
LH: loop header
LB: loop body
LE: loop exit
PB: predicated region body
PF: predicated region fallthrough
CT: control target
= control target key end

     0   :  { %vm14_vm0 = vcmask 261120   ;;  %s135_s0 = inlined_call_operand.vmem [shape: f32[8,32], index: 0, kind: input, shape index: {}]   ;;  %s136_s1 = inlined_call_operand.vmem [shape: s32[8,1], index: 1, kind: input, shape index: {}]   ;;  %s137_s2 = inlined_call_operand.hbm [shape: f32[1,8,128], index: 2, kind: output, shape index: {}]  }
   0x1   :  { %v12_v0 = vld [vmem:[%s135_s0] sm:$0xff] }
   0x2   :  { %7 = vsyncpa [#allocation3], 0  ;;  %v15_v1 = vsel %vm14_vm0, %v12_v0, -inf  ;;  %v97_v2 = vmov 0   ;;  %v13_v3 = vld [vmem:[%s136_s1] sm:$0xff]  ;;  %v26_v7 = vlaneseq  ;;  %vm37_vm2 = vcmask 7168  }
   0x3   :  { %68 = vset.pattern.permute.xlu0 %v97_v2  ;;  %s98_s0 = smov [#allocation2]  }
   0x4   :  { %16 = vmax.xlane.f32.xlu0 %v15_v1  ;;  %v27_v8 = vand.u32 127, %v26_v7  ;;  %s56_s1 = sshll.u32 %s98_s0, 4  ;;  %s57_s1 = int_to_ptr.vmem [resolvable:$true] %s56_s1 }
   0x5   :  { %s73_s14 = scalar_lea.vmem %s57_s1, 128  ;;  %p78_p1 = scmp.lt.s32.totalorder %s57_s1, %s57_s1 }
   0x6   :  { %p74_p0 = scmp.ne.s32.totalorder %s57_s1, %s73_s14  ;;  %p79_p2 = scmp.lt.s32.totalorder %s73_s14, %s73_s14 }
   0x8   :  { %p80_p3 = por %p79_p2, %p78_p1 }
   0xa   :  { %p81_p4 = pnand %p80_p3, %p74_p0 }
  0x1a   :  { %29 = vperm.xlu0 %68, %v13_v3  }
  0x91   :  { %v17_v4 = vpop.xlane.xlu0 %16 }
  0x92   :  { %v18_v5 = vsub.f32 %v12_v0, %v17_v4 }
  0x94   :  { %v19_v6 = vmul.f32 1.442695, %v18_v5 }
  0x96   :  { %69 = vpow2.f32 %v19_v6 }
  0x99   :  { %v30_v9 = vpop.permute.xlu0 %29 }
  0x9a   :  { %vm31_vm1 = vcmp.eq.s32.totalorder %v27_v8, %v30_v9 }
  0x9b   :  { %v32_v12 = vsel %vm31_vm1, %v18_v5, 0.0 }
  0x9c   :  { %v33_v13 = vsel %vm14_vm0, %v32_v12, 0.0 }
  0xa0   :  { %v70_v10 = vpop.eup %69 }
  0xa1   :  { %v21_v11 = vsel %vm14_vm0, %v70_v10, 0.0 }
  0xa2   :  { %22 = vadd.xlane.f32.xlu1 %v21_v11 }
  0xa6   :  { %34 = vadd.xlane.f32.xlu1 %v33_v13 }
 0x12f   :  { %v23_v14 = vpop.xlane.xlu1 %22 }
 0x130   :  { %71 = vlog2.f32 %v23_v14 }
 0x133   :  { %v35_v17 = vpop.xlane.xlu1 %34 }
 0x13a   :  { %v72_v15 = vpop.eup %71 }
 0x13b   :  { %v25_v16 = vmul.f32 0.6931472, %v72_v15 }
 0x13d   :  { %v36_v18 = vsub.f32 %v25_v16, %v35_v17 }
 0x13f   :  { %v38_v19 = vsel %vm37_vm2, %v36_v18, 0.0 }
 0x140   :  { %39 = vadd.xlane.f32.xlu1 %v38_v19 }
 0x1cd   :  { %v40_v20 = vpop.xlane.xlu1 %39 }
 0x1ce   :  { %v41_v21 = vrot.slane %v40_v20, 4 }
 0x1d0   :  { %v42_v22 = vadd.f32 %v41_v21, %v40_v20 }
 0x1d2   :  { %v43_v23 = vrot.slane %v42_v22, 2 }
 0x1d4   :  { %v44_v24 = vadd.f32 %v43_v23, %v42_v22 }
 0x1d6   :  { %v45_v25 = vrot.slane %v44_v24, 1 }
 0x1d8   :  { %v46_v26 = vadd.f32 %v45_v25, %v44_v24 }
 0x1da   :  { %64 = vpush %v46_v26 }
 0x20b   :  { %s65_s13 = spop %64 }
 0x20c   :  { %v48_v27 = vstv %s65_s13 }
 0x20d   :  { %49 = vst [vmem:[#allocation2] sm:$0xff] %v48_v27 }
 0x20e   :  { %84 = shalt.err (!%p81_p4)
}
 0x20f   :  { %s85_s17 = scalar_lea.hbm %s137_s2, 128 }
 0x210   :  { %p86_p5 = scmp.ne.s32.totalorder %s137_s2, %s85_s17  ;;  %p89_p6 = scmp.lt.u32.totalorder %s85_s17, %s137_s2 }
 0x212   :  { %p91_p7 = pnand %p89_p6, %p86_p5 }
 0x214   :  { %94 = shalt.err (!%p91_p7)
}
 0x215   :  { %59 = dma.vmem_to_hbm [thread:$0]  %s57_s1, 128, %s137_s2, [#allocation3]  }
 0x216   :  { %95 = dma.done.wait [#allocation3], 128  }
 0x217   :  { %96 = vsyncadd [#allocation3], 4294967168 }
 0x218   :  { %63 = vsyncpa [#allocation3], 1 }

</bundles_post_ra>
